<compile_context>
chip_gen: v7x
topology: tpu7x:2x2x1
jax: 0.10.0
libtpu: 0.0.40
codegen_flags: <defaults>
</compile_context>

<pallas_src>
import jax
import jax.numpy as jnp
from jax.experimental import pallas as pl
from jax.experimental.pallas import tpu as pltpu

LANES = 128


def _row_multiple(dtype) -> int:
    """Sublane multiple: 8 rows for 32-bit, 16 for 16-bit, 32 for 8-bit dtypes."""
    return max(8, 32 // jnp.dtype(dtype).itemsize)


def _default_num_cores() -> int:
    """2 on megacore-style chips (v4 / v5p / v7x), else 1.

    Correctness never depends on this: an over-estimate only re-reads one
    fully-masked clamped tile; an under-estimate only loses the cross-core
    split on this HBM-bound reduction.
    """
    try:
        kind = jax.devices()[0].device_kind.lower()
    except Exception:
        return 1
    return 2 if any(tag in kind for tag in ("v4", "v5p", "v7")) else 1


def _make_loss_kernel(rows, trows, steps, need_mask):
    groups = trows // 8

    def accumulate(d, acc_sq, acc_abs):
        # Tree-sum the (trows,128) tile down to one (8,128) vreg per
        # accumulator.  The reshape keeps (8,128) hardware tiles intact, so
        # the reduction is pure VALU adds; only two vregs are stored per step.
        d3 = d.reshape(groups, 8, LANES)
        acc_sq[...] += jnp.sum(d3 * d3, axis=0)
        acc_abs[...] += jnp.sum(jnp.abs(d3), axis=0)

    def kernel(x_ref, y_ref, sq_ref, abs_ref, acc_sq, acc_abs):
        i = pl.program_id(0)   # core (megacore split)
        j = pl.program_id(1)   # reduction step within this core

        @pl.when(j == 0)
        def _():
            acc_sq[...] = jnp.zeros_like(acc_sq)
            acc_abs[...] = jnp.zeros_like(acc_abs)

        d = x_ref[...].astype(jnp.float32) - y_ref[...].astype(jnp.float32)

        if need_mask:
            logical_block = i * steps + j
            row_start = logical_block * trows
            is_tail = row_start + trows > rows   # partial tail OR clamped block

            # Mask work only on the (at most one per core) tail/clamped block;
            # the steady-state path below does no iota/compare/select.
            @pl.when(is_tail)
            def _():
                row_ids = jax.lax.broadcasted_iota(jnp.int32, (trows, LANES), 0)
                valid = (row_start + row_ids) < rows
                accumulate(jnp.where(valid, d, 0.0), acc_sq, acc_abs)

            @pl.when(jnp.logical_not(is_tail))
            def _():
                accumulate(d, acc_sq, acc_abs)
        else:
            accumulate(d, acc_sq, acc_abs)

        @pl.when(j == steps - 1)
        def _():
            sq_ref[...] = acc_sq[...]
            abs_ref[...] = acc_abs[...]

    return kernel


def combi_rmse_and_mae_loss(x, y, *, tile_rows=4096, num_cores=None):
    """sqrt(MSE(x, y)) + MAE(x, y), means taken over all elements."""
    assert x.shape == y.shape, "x and y must have the same shape"
    n_elems = x.size
    assert n_elems > 0
    n = jnp.float32(n_elems)

    xf = jnp.ravel(x)
    yf = jnp.ravel(y)

    row_mult = max(_row_multiple(x.dtype), _row_multiple(y.dtype))
    rows = n_elems // LANES

    # Tiny inputs: not worth a kernel launch.
    if rows < row_mult:
        d = xf.astype(jnp.float32) - yf.astype(jnp.float32)
        return jnp.sqrt(jnp.sum(d * d) / n) + jnp.sum(jnp.abs(d)) / n

    main = rows * LANES
    rem = n_elems - main
    # Lane-dense (rows, 128) main slab.  For 128-aligned sizes (the common
    # case) ravel+reshape is a pure metadata change; for awkward sizes the
    # <128-element remainder is folded in via a tiny JAX epilogue instead of
    # jnp.pad-copying the whole tensor.
    x2d = xf[:main].reshape(rows, LANES)
    y2d = yf[:main].reshape(rows, LANES)

    if num_cores is None:
        num_cores = _default_num_cores()

    # Tile sizing: biggest row tile whose double-buffered inputs stay <=~36 MiB
    # (fits v7x's 64 MiB/TC with headroom; trivially fits v5e/v6e).  Inputs
    # keep their HBM dtype (bf16 stays bf16 -> half the HBM bytes); the
    # in-kernel astype does the upcast.
    bytes_per_row = LANES * (x2d.dtype.itemsize + y2d.dtype.itemsize)
    max_tile_rows = (36 << 20) // (2 * bytes_per_row)
    trows = min(tile_rows, max_tile_rows, rows)
    trows = max(row_mult, (trows // row_mult) * row_mult)

    grid_n = pl.cdiv(rows, trows)           # logical number of row blocks
    steps = pl.cdiv(grid_n, num_cores)      # reduction steps per core
    need_clamp = num_cores * steps != grid_n
    need_mask = num_cores * steps * trows != rows

    if need_clamp:
        def in_index_map(i, j):
            return (jnp.minimum(i * steps + j, grid_n - 1), 0)
    else:
        def in_index_map(i, j):
            return (i * steps + j, 0)

    in_spec = pl.BlockSpec((trows, LANES), in_index_map)
    # Per-core partials as lane-dense (8,128) blocks (leading core dim
    # squeezed): no (1,1) scalar VMEM stores and no in-kernel XLU reduce.
    out_spec = pl.BlockSpec((None, 8, LANES), lambda i, j: (i, 0, 0))

    kernel = _make_loss_kernel(rows, trows, steps, need_mask)

    tile_bytes = trows * bytes_per_row
    vmem_limit = int(min(max(2 * tile_bytes + (4 << 20), 8 << 20), 48 << 20))

    sq_part, abs_part = pl.pallas_call(
        kernel,
        out_shape=(
            jax.ShapeDtypeStruct((num_cores, 8, LANES), jnp.float32),
            jax.ShapeDtypeStruct((num_cores, 8, LANES), jnp.float32),
        ),
        grid_spec=pltpu.PrefetchScalarGridSpec(
            num_scalar_prefetch=0,
            grid=(num_cores, steps),
            in_specs=[in_spec, in_spec],
            out_specs=(out_spec, out_spec),
            scratch_shapes=[
                pltpu.VMEM((8, LANES), jnp.float32),
                pltpu.VMEM((8, LANES), jnp.float32),
            ],
        ),
        compiler_params=pltpu.CompilerParams(
            # TODO(synk): on v7x verify the leading axis really shards across
            # both TensorCores; switch to pltpu.CORE_PARALLEL if "parallel"
            # does not produce a 2-TC split in the Mosaic dump.
            dimension_semantics=("parallel", "arbitrary"),
            vmem_limit_bytes=vmem_limit,
        ),
    )(x2d, y2d)

    sq_total = jnp.sum(sq_part)
    abs_total = jnp.sum(abs_part)

    if rem:
        dr = xf[main:].astype(jnp.float32) - yf[main:].astype(jnp.float32)
        sq_total = sq_total + jnp.sum(dr * dr)
        abs_total = abs_total + jnp.sum(jnp.abs(dr))

    return jnp.sqrt(sq_total / n) + abs_total / n


def _reference(x, y):
    x = x.astype(jnp.float32)
    y = y.astype(jnp.float32)
    return jnp.sqrt(jnp.mean((x - y) ** 2)) + jnp.mean(jnp.abs(x - y))


if __name__ == "__main__":
    key = jax.random.PRNGKey(0)
    kx, ky = jax.random.split(key)

    # Small NCHW-shaped inputs, consistent with a segmentation-style loss.
    shape = (2, 4, 16, 16)
    x = jax.random.normal(kx, shape, dtype=jnp.float32)
    y = jax.random.normal(ky, shape, dtype=jnp.float32)
    loss = jax.block_until_ready(combi_rmse_and_mae_loss(x, y))
    ref = jax.block_until_ready(_reference(x, y))
    assert jnp.allclose(loss, ref, rtol=1e-5, atol=1e-5), (loss, ref)

    # Awkward, non-128-aligned shape: exercises the sliced main slab, the
    # gated in-kernel row-tail mask, and the <128-element JAX epilogue.
    shape2 = (3, 5, 7, 11)
    x2 = jax.random.normal(kx, shape2, dtype=jnp.float32)
    y2 = jax.random.normal(ky, shape2, dtype=jnp.float32)
    loss2 = jax.block_until_ready(combi_rmse_and_mae_loss(x2, y2))
    ref2 = jax.block_until_ready(_reference(x2, y2))
    assert jnp.allclose(loss2, ref2, rtol=1e-5, atol=1e-5), (loss2, ref2)

    # bf16 inputs stay bf16 in HBM (halved bandwidth); 16-row sublane multiple.
    shape3 = (4, 8, 32, 32)
    x3 = jax.random.normal(kx, shape3, dtype=jnp.bfloat16)
    y3 = jax.random.normal(ky, shape3, dtype=jnp.bfloat16)
    loss3 = jax.block_until_ready(combi_rmse_and_mae_loss(x3, y3))
    ref3 = jax.block_until_ready(_reference(x3, y3))
    assert jnp.allclose(loss3, ref3, rtol=1e-4, atol=1e-4), (loss3, ref3)

    print("KERNEL_OK")
</pallas_src>

<mosaic_0001>
module attributes {stable_mosaic.version = 11 : i64} {
  func.func @kernel(%arg0: i32, %arg1: i32, %arg2: memref<16x128xf32, #tpu.memory_space<vmem>>, %arg3: memref<16x128xf32, #tpu.memory_space<vmem>>, %arg4: memref<1x8x128xf32, #tpu.memory_space<vmem>>, %arg5: memref<1x8x128xf32, #tpu.memory_space<vmem>>, %arg6: memref<8x128xf32, #tpu.memory_space<vmem>>, %arg7: memref<8x128xf32, #tpu.memory_space<vmem>>) attributes {dimension_semantics = [#tpu.dimension_semantics<parallel>, #tpu.dimension_semantics<arbitrary>], iteration_bounds = array<i64: 1, 1>, scalar_prefetch = 0 : i64, scratch_operands = 2 : i64, tpu.core_type = #tpu.core_type<tc>, window_params = [{transform_indices = @transform_0, window_bounds = array<i64: 16, 128>}, {transform_indices = @transform_1, window_bounds = array<i64: 16, 128>}, {transform_indices = @transform_2, window_bounds = array<i64: 1, 8, 128>}, {transform_indices = @transform_3, window_bounds = array<i64: 1, 8, 128>}]} {
    %c0_i32 = arith.constant 0 : i32
    %0 = arith.cmpi eq, %arg1, %c0_i32 : i32
    %1 = arith.extui %0 : i1 to i32
    %c0_i32_0 = arith.constant 0 : i32
    %2 = arith.cmpi ne, %1, %c0_i32_0 : i32
    scf.if %2 {
      %cst_15 = arith.constant 0.000000e+00 : f32
      %20 = vector.broadcast %cst_15 : f32 to vector<8x128xf32>
      %c0_16 = arith.constant 0 : index
      %c0_17 = arith.constant 0 : index
      %21 = vector.load %arg6[%c0_16, %c0_17] : memref<8x128xf32, #tpu.memory_space<vmem>>, vector<8x128xf32>
      tpu.vector_store %arg6[%c0_16, %c0_17], %20 {strides = array<i32>} : memref<8x128xf32, #tpu.memory_space<vmem>>, vector<8x128xf32>,
      %cst_18 = arith.constant 0.000000e+00 : f32
      %22 = vector.broadcast %cst_18 : f32 to vector<8x128xf32>
      %c0_19 = arith.constant 0 : index
      %c0_20 = arith.constant 0 : index
      %23 = vector.load %arg7[%c0_19, %c0_20] : memref<8x128xf32, #tpu.memory_space<vmem>>, vector<8x128xf32>
      tpu.vector_store %arg7[%c0_19, %c0_20], %22 {strides = array<i32>} : memref<8x128xf32, #tpu.memory_space<vmem>>, vector<8x128xf32>,
    } else {
    }
    %c0 = arith.constant 0 : index
    %c0_1 = arith.constant 0 : index
    %3 = vector.load %arg2[%c0, %c0_1] : memref<16x128xf32, #tpu.memory_space<vmem>>, vector<16x128xf32>
    %c0_2 = arith.constant 0 : index
    %c0_3 = arith.constant 0 : index
    %4 = vector.load %arg3[%c0_2, %c0_3] : memref<16x128xf32, #tpu.memory_space<vmem>>, vector<16x128xf32>
    %5 = arith.subf %3, %4 : vector<16x128xf32>
    %6 = vector.shape_cast %5 : vector<16x128xf32> to vector<2x8x128xf32>
    %c0_4 = arith.constant 0 : index
    %c0_5 = arith.constant 0 : index
    %7 = vector.load %arg6[%c0_4, %c0_5] : memref<8x128xf32, #tpu.memory_space<vmem>>, vector<8x128xf32>
    %8 = arith.mulf %6, %6 : vector<2x8x128xf32>
    %cst = arith.constant dense<0.000000e+00> : vector<8x128xf32>
    %9 = vector.multi_reduction <add>, %8, %cst [0] : vector<2x8x128xf32> to vector<8x128xf32>
    %10 = arith.addf %7, %9 : vector<8x128xf32>
    %c0_6 = arith.constant 0 : index
    %c0_7 = arith.constant 0 : index
    %11 = vector.load %arg6[%c0_6, %c0_7] : memref<8x128xf32, #tpu.memory_space<vmem>>, vector<8x128xf32>
    tpu.vector_store %arg6[%c0_6, %c0_7], %10 {strides = array<i32>} : memref<8x128xf32, #tpu.memory_space<vmem>>, vector<8x128xf32>,
    %c0_8 = arith.constant 0 : index
    %c0_9 = arith.constant 0 : index
    %12 = vector.load %arg7[%c0_8, %c0_9] : memref<8x128xf32, #tpu.memory_space<vmem>>, vector<8x128xf32>
    %13 = math.absf %6 : vector<2x8x128xf32>
    %cst_10 = arith.constant dense<0.000000e+00> : vector<8x128xf32>
    %14 = vector.multi_reduction <add>, %13, %cst_10 [0] : vector<2x8x128xf32> to vector<8x128xf32>
    %15 = arith.addf %12, %14 : vector<8x128xf32>
    %c0_11 = arith.constant 0 : index
    %c0_12 = arith.constant 0 : index
    %16 = vector.load %arg7[%c0_11, %c0_12] : memref<8x128xf32, #tpu.memory_space<vmem>>, vector<8x128xf32>
    tpu.vector_store %arg7[%c0_11, %c0_12], %15 {strides = array<i32>} : memref<8x128xf32, #tpu.memory_space<vmem>>, vector<8x128xf32>,
    %c0_i32_13 = arith.constant 0 : i32
    %17 = arith.cmpi eq, %arg1, %c0_i32_13 : i32
    %18 = arith.extui %17 : i1 to i32
    %c0_i32_14 = arith.constant 0 : i32
    %19 = arith.cmpi ne, %18, %c0_i32_14 : i32
    scf.if %19 {
      %c0_15 = arith.constant 0 : index
      %c0_16 = arith.constant 0 : index
      %20 = vector.load %arg6[%c0_15, %c0_16] : memref<8x128xf32, #tpu.memory_space<vmem>>, vector<8x128xf32>
      %c0_17 = arith.constant 0 : index
      %c0_18 = arith.constant 0 : index
      %c0_19 = arith.constant 0 : index
      %21 = vector.load %arg4[%c0_17, %c0_18, %c0_19] : memref<1x8x128xf32, #tpu.memory_space<vmem>>, vector<1x8x128xf32>
      %22 = vector.shape_cast %21 : vector<1x8x128xf32> to vector<8x128xf32>
      %23 = vector.shape_cast %20 : vector<8x128xf32> to vector<1x8x128xf32>
      tpu.vector_store %arg4[%c0_17, %c0_18, %c0_19], %23 {strides = array<i32>} : memref<1x8x128xf32, #tpu.memory_space<vmem>>, vector<1x8x128xf32>,
      %c0_20 = arith.constant 0 : index
      %c0_21 = arith.constant 0 : index
      %24 = vector.load %arg7[%c0_20, %c0_21] : memref<8x128xf32, #tpu.memory_space<vmem>>, vector<8x128xf32>
      %c0_22 = arith.constant 0 : index
      %c0_23 = arith.constant 0 : index
      %c0_24 = arith.constant 0 : index
      %25 = vector.load %arg5[%c0_22, %c0_23, %c0_24] : memref<1x8x128xf32, #tpu.memory_space<vmem>>, vector<1x8x128xf32>
      %26 = vector.shape_cast %25 : vector<1x8x128xf32> to vector<8x128xf32>
      %27 = vector.shape_cast %24 : vector<8x128xf32> to vector<1x8x128xf32>
      tpu.vector_store %arg5[%c0_22, %c0_23, %c0_24], %27 {strides = array<i32>} : memref<1x8x128xf32, #tpu.memory_space<vmem>>, vector<1x8x128xf32>,
    } else {
    }
    return
  }
  func.func @transform_0(%arg0: i32, %arg1: i32) -> (i32, i32) {
    %c1_i32 = arith.constant 1 : i32
    %0 = arith.muli %arg0, %c1_i32 : i32
    %1 = arith.addi %0, %arg1 : i32
    %c0_i32 = arith.constant 0 : i32
    %c0_i32_0 = arith.constant 0 : i32
    return %1, %c0_i32 : i32, i32
  }
  func.func @transform_1(%arg0: i32, %arg1: i32) -> (i32, i32) {
    %c1_i32 = arith.constant 1 : i32
    %0 = arith.muli %arg0, %c1_i32 : i32
    %1 = arith.addi %0, %arg1 : i32
    %c0_i32 = arith.constant 0 : i32
    %c0_i32_0 = arith.constant 0 : i32
    return %1, %c0_i32 : i32, i32
  }
  func.func @transform_2(%arg0: i32, %arg1: i32) -> (i32, i32, i32) {
    %c0_i32 = arith.constant 0 : i32
    %c0_i32_0 = arith.constant 0 : i32
    %c0_i32_1 = arith.constant 0 : i32
    return %arg0, %c0_i32, %c0_i32_0 : i32, i32, i32
  }
  func.func @transform_3(%arg0: i32, %arg1: i32) -> (i32, i32, i32) {
    %c0_i32 = arith.constant 0 : i32
    %c0_i32_0 = arith.constant 0 : i32
    %c0_i32_1 = arith.constant 0 : i32
    return %arg0, %c0_i32, %c0_i32_0 : i32, i32, i32
  }
}

</mosaic_0001>

<bundles_post_ra>
// kernel: tpu_custom_call.1
= control target key start
LH: loop header
LB: loop body
LE: loop exit
PB: predicated region body
PF: predicated region fallthrough
CT: control target
= control target key end

     0   :  { %9 = vsyncpa [#allocation5], 0  ;;  %s292_s0 = inlined_call_operand.hbm [shape: f32[16,128], index: 0, kind: input, shape index: {}]   ;;  %s293_s1 = inlined_call_operand.hbm [shape: f32[16,128], index: 1, kind: input, shape index: {}]   ;;  %s294_s2 = inlined_call_operand.hbm [shape: f32[1,8,128], index: 2, kind: output, shape index: {0}]   ;;  %s295_s3 = inlined_call_operand.hbm [shape: f32[1,8,128], index: 3, kind: output, shape index: {1}]  }
   0x1   :  { %10 = vsyncpa [#allocation8], 0 }
   0x2   :  { %11 = vsyncpa [#allocation6], 0 }
   0x3   :  { %12 = vsyncpa [#allocation11], 0  ;;  %s218_s12 = smov [#allocation4]   ;;  %s122_s16 = scalar_lea.hbm %s292_s0, 256 }
   0x4   :  { %s22_s13 = sshll.u32 %s218_s12, 4  ;;  %p123_p0 = scmp.ne.s32.totalorder %s292_s0, %s122_s16  ;;  %s23_s13 = int_to_ptr.vmem [resolvable:$true] %s22_s13 }
   0x5   :  { %p126_p1 = scmp.lt.u32.totalorder %s122_s16, %s292_s0 }
   0x7   :  { %p128_p2 = pnand %p126_p1, %p123_p0 }
   0x9   :  { %131 = shalt.err (!%p128_p2)
}
   0xa   :  { %s132_s21 = scalar_lea.vmem %s23_s13, 256  ;;  %p137_p4 = scmp.lt.s32.totalorder %s23_s13, %s23_s13 }
   0xb   :  { %p133_p3 = scmp.ne.s32.totalorder %s23_s13, %s132_s21  ;;  %p138_p5 = scmp.lt.s32.totalorder %s132_s21, %s132_s21 }
   0xd   :  { %p139_p6 = por %p138_p5, %p137_p4 }
   0xf   :  { %p140_p7 = pnand %p139_p6, %p133_p3 }
  0x11   :  { %143 = shalt.err (!%p140_p7)
}
  0x12   :  { %s219_s22 = smov 128   ;;  %s220_s23 = smov 8  }
  0x13   :  { %28 = dma.hbm_to_vmem [thread:$0]  %s292_s0, 256, %s23_s13, [#allocation5], %s219_s22, %s219_s22, %s220_s23  }
  0x14   :  { %s221_s26 = smov [#allocation7]   ;;  %s144_s30 = scalar_lea.hbm %s293_s1, 256 }
  0x15   :  { %s38_s27 = sshll.u32 %s221_s26, 4  ;;  %p145_p8 = scmp.ne.s32.totalorder %s293_s1, %s144_s30  ;;  %s39_s27 = int_to_ptr.vmem [resolvable:$true] %s38_s27 }
  0x16   :  { %p148_p9 = scmp.lt.u32.totalorder %s144_s30, %s293_s1 }
  0x18   :  { %p150_p10 = pnand %p148_p9, %p145_p8 }
  0x1a   :  { %153 = shalt.err (!%p150_p10)
}
  0x1b   :  { %s154_s8 = scalar_lea.vmem %s39_s27, 256  ;;  %p159_p12 = scmp.lt.s32.totalorder %s39_s27, %s39_s27 }
  0x1c   :  { %p155_p11 = scmp.ne.s32.totalorder %s39_s27, %s154_s8  ;;  %p160_p13 = scmp.lt.s32.totalorder %s154_s8, %s154_s8 }
  0x1e   :  { %p161_p0 = por %p160_p13, %p159_p12 }
  0x20   :  { %p162_p1 = pnand %p161_p0, %p155_p11 }
  0x22   :  { %165 = shalt.err (!%p162_p1)
}
  0x23   :  { %44 = dma.hbm_to_vmem [thread:$0]  %s293_s1, 256, %s39_s27, [#allocation8], %s219_s22, %s219_s22, %s220_s23  }
  0x24   :  { %210 = dma.done.wait [#allocation5], 256  }
  0x25   :  { %211 = vsyncadd [#allocation5], 4294967040 }
  0x26   :  { %212 = dma.done.wait [#allocation8], 256  }
  0x27   :  { %213 = vsyncadd [#allocation8], 4294967040  ;;  %v61_v0 = vld [vmem:[#allocation4] sm:$0xff]  ;;  %v62_v1 = vld [vmem:[#allocation4 + $0x8] sm:$0xff]  ;;  %s222_s10 = smov [#allocation9]   ;;  %s223_s12 = smov [#allocation10]  }
  0x28   :  { %v63_v2 = vld [vmem:[#allocation7] sm:$0xff]  ;;  %v64_v3 = vld [vmem:[#allocation7 + $0x8] sm:$0xff]  ;;  %s92_s11 = sshll.u32 %s222_s10, 4  ;;  %s102_s13 = sshll.u32 %s223_s12, 4  ;;  %s93_s11 = int_to_ptr.vmem [resolvable:$true] %s92_s11  ;;  %s103_s13 = int_to_ptr.vmem [resolvable:$true] %s102_s13 }
  0x29   :  { %v65_v4 = vsub.f32 %v61_v0, %v63_v2  ;;  %v66_v5 = vsub.f32 %v62_v1, %v64_v3  ;;  %s166_s1 = scalar_lea.vmem %s93_s11, 128  ;;  %p171_p3 = scmp.lt.s32.totalorder %s93_s11, %s93_s11 }
  0x2a   :  { %p167_p2 = scmp.ne.s32.totalorder %s93_s11, %s166_s1  ;;  %p172_p4 = scmp.lt.s32.totalorder %s166_s1, %s166_s1 }
  0x2b   :  { %v68_v6 = vmul.f32 %v65_v4, %v65_v4  ;;  %v74_v7 = vand.u32 2147483647, %v65_v4  ;;  %v69_v8 = vmul.f32 %v66_v5, %v66_v5  ;;  %v75_v9 = vand.u32 2147483647, %v66_v5 }
  0x2c   :  { %p173_p5 = por %p172_p4, %p171_p3 }
  0x2d   :  { %v70_v10 = vadd.f32 %v69_v8, %v68_v6  ;;  %v76_v11 = vadd.f32 %v75_v9, %v74_v7 }
  0x2e   :  { %p174_p6 = pnand %p173_p5, %p167_p2 }
  0x2f   :  { %83 = vst [vmem:[#allocation9] sm:$0xff] %v70_v10  ;;  %85 = vst [vmem:[#allocation10] sm:$0xff] %v76_v11 }
  0x30   :  { %177 = shalt.err (!%p174_p6)
}
  0x31   :  { %s178_s16 = scalar_lea.hbm %s294_s2, 128 }
  0x32   :  { %p179_p7 = scmp.ne.s32.totalorder %s294_s2, %s178_s16  ;;  %p182_p8 = scmp.lt.u32.totalorder %s178_s16, %s294_s2 }
  0x34   :  { %p184_p9 = pnand %p182_p8, %p179_p7 }
  0x36   :  { %187 = shalt.err (!%p184_p9)
}
  0x37   :  { %95 = dma.vmem_to_hbm [thread:$0]  %s93_s11, 128, %s294_s2, [#allocation6]  }
  0x38   :  { %s188_s23 = scalar_lea.vmem %s103_s13, 128  ;;  %p193_p11 = scmp.lt.s32.totalorder %s103_s13, %s103_s13 }
  0x39   :  { %p189_p10 = scmp.ne.s32.totalorder %s103_s13, %s188_s23  ;;  %p194_p12 = scmp.lt.s32.totalorder %s188_s23, %s188_s23 }
  0x3b   :  { %p195_p13 = por %p194_p12, %p193_p11 }
  0x3d   :  { %p196_p0 = pnand %p195_p13, %p189_p10 }
  0x3f   :  { %199 = shalt.err (!%p196_p0)
}
  0x40   :  { %s200_s26 = scalar_lea.hbm %s295_s3, 128 }
  0x41   :  { %p201_p1 = scmp.ne.s32.totalorder %s295_s3, %s200_s26  ;;  %p204_p2 = scmp.lt.u32.totalorder %s200_s26, %s295_s3 }
  0x43   :  { %p206_p3 = pnand %p204_p2, %p201_p1 }
  0x45   :  { %209 = shalt.err (!%p206_p3)
}
  0x46   :  { %105 = dma.vmem_to_hbm [thread:$0]  %s103_s13, 128, %s295_s3, [#allocation11]  }
  0x47   :  { %214 = dma.done.wait [#allocation6], 128  }
  0x48   :  { %215 = vsyncadd [#allocation6], 4294967168 }
  0x49   :  { %216 = dma.done.wait [#allocation11], 128  }
  0x4a   :  { %217 = vsyncadd [#allocation11], 4294967168 }
  0x4b   :  { %112 = vsyncpa [#allocation5], 1 }
  0x4c   :  { %113 = vsyncpa [#allocation8], 1 }
  0x4d   :  { %114 = vsyncpa [#allocation6], 1 }
  0x4e   :  { %115 = vsyncpa [#allocation11], 1 }

</bundles_post_ra>
